<compile_context>
chip_gen: v7x
topology: tpu7x:2x2x1
jax: 0.10.0
libtpu: 0.0.40
codegen_flags: <defaults>
</compile_context>

<pallas_src>
import functools

import jax
import jax.numpy as jnp
from jax.experimental import pallas as pl
from jax.experimental.pallas import tpu as pltpu


def _round_up(x, m):
    return ((x + m - 1) // m) * m


def _choose_vocab_tile(vocab, tv_max):
    """Pick a lane-dense vocab tile; prefer one that divides vocab exactly so
    v_pad == vocab and the post-kernel slice is a no-op (no output copy)."""
    tv_max = max(128, (tv_max // 128) * 128)
    if vocab % 128 == 0:
        start = min(tv_max, vocab)
        for cand in range(start, 127, -128):
            if vocab % cand == 0:
                return cand, vocab          # no vocab padding needed
    tv_eff = min(tv_max, _round_up(vocab, 128))
    return tv_eff, _round_up(vocab, tv_eff)


def _generator_kernel(x_ref, w_ref, b_ref, o_ref, m_ref, s_ref, lse_ref,
                      cache_ref):
    """Grid = (row tiles, 2 passes, vocab tiles).

    Pass p==0: compute the logits tile once, cache it, update running max/sum.
    Pass p==1: read the cached tile and write logits - logsumexp.
    """
    p = pl.program_id(1)
    j = pl.program_id(2)

    @pl.when(p == 0)
    def _pass0():
        @pl.when(j == 0)
        def _init():
            m_ref[...] = jnp.full(m_ref.shape, -jnp.inf, dtype=m_ref.dtype)
            s_ref[...] = jnp.zeros(s_ref.shape, dtype=s_ref.dtype)

        # (tm, tv) logits: bf16 MXU matmul with f32 accumulation, f32 bias add.
        # Weight tile is (tv, d_model); contract over d_model (no transpose).
        logits = jax.lax.dot_general(
            x_ref[...], w_ref[...],
            dimension_numbers=(((1,), (1,)), ((), ())),
            preferred_element_type=jnp.float32,
        ) + b_ref[...]

        # Cache the logits tile so pass 1 never re-runs the matmul.
        cache_ref[j] = logits.astype(cache_ref.dtype)

        # Online max / sum-exp accumulation (m_prev = -inf on the first tile
        # gives exp(-inf)*0 = 0; m_new stays finite because every tile keeps
        # at least one real (non -1e30-biased) column).
        m_prev = m_ref[...]
        m_new = jnp.maximum(m_prev, jnp.max(logits, axis=-1, keepdims=True))
        s_ref[...] = (s_ref[...] * jnp.exp(m_prev - m_new)
                      + jnp.sum(jnp.exp(logits - m_new), axis=-1,
                                keepdims=True))
        m_ref[...] = m_new

    @pl.when(p == 1)
    def _pass1():
        @pl.when(j == 0)
        def _lse():  # logsumexp computed once per row tile, not per vocab tile
            lse_ref[...] = m_ref[...] + jnp.log(s_ref[...])
        o_ref[...] = (cache_ref[j].astype(jnp.float32)
                      - lse_ref[...]).astype(o_ref.dtype)


def generator_forward(x, weight, bias, *, tm=256, tv=2048,
                      out_dtype=jnp.bfloat16, cache_dtype=None):
    """log_softmax(x @ weight.T + bias, axis=-1) as one fused Pallas kernel.

    x:      (batch, seq, d_model)
    weight: (vocab, d_model)   -- nn.Linear layout; pass it pre-cast to bf16
    bias:   (vocab,)
    """
    batch, seq, d_model = x.shape
    vocab = weight.shape[0]
    n = batch * seq

    # ---- tile sizes ---------------------------------------------------------
    # TODO(synk): tm/tv are generation-specific (v6e wants tm~512, v7x tm~256
    # with a bf16 cache); defaults target the 64 MiB-VMEM v7x budget.
    tv_eff, v_pad = _choose_vocab_tile(vocab, tv)
    nvt = v_pad // tv_eff

    tm_eff = min(tm, _round_up(n, 16))        # >=16 sublanes for bf16 tiles
    # Keep >= 2 row tiles when possible so the parallel row axis can split
    # across the two TensorCores on v7x.
    if n > 16 and _round_up(n, tm_eff) // tm_eff < 2:
        tm_eff = min(tm_eff, _round_up((n + 1) // 2, 16))
    n_pad = _round_up(n, tm_eff)

    # Logits cache dtype: f32 where the VMEM budget allows, bf16 otherwise.
    if cache_dtype is None:
        cache_dtype = (jnp.float32 if tm_eff * v_pad * 4 <= (24 << 20)
                       else jnp.bfloat16)

    # ---- operand preparation (only x is cast/padded per call) ---------------
    x2d = x.reshape(n, d_model).astype(jnp.bfloat16)
    if n_pad != n:
        x2d = jnp.pad(x2d, ((0, n_pad - n), (0, 0)))

    w = weight if weight.dtype == jnp.bfloat16 else weight.astype(jnp.bfloat16)
    b = bias if bias.dtype == jnp.float32 else bias.astype(jnp.float32)
    if v_pad != vocab:
        # Padded vocab columns get a huge negative bias -> exp() contributes 0;
        # they are sliced off below.  (Only hit when vocab % 128 != 0.)
        w = jnp.pad(w, ((0, v_pad - vocab), (0, 0)))
        b = jnp.pad(b, (0, v_pad - vocab), constant_values=-1e30)
    b2d = b.reshape(1, v_pad)

    # ---- VMEM budget estimate (double buffers for pipelined operands) -------
    isz = lambda dt: jnp.dtype(dt).itemsize
    est = (2 * tm_eff * d_model * 2            # x tile
           + 2 * tv_eff * d_model * 2          # W double buffer
           + 2 * tv_eff * 4                    # bias
           + 2 * tm_eff * tv_eff * isz(out_dtype)     # output double buffer
           + nvt * tm_eff * tv_eff * isz(cache_dtype)  # logits cache
           + 4 * tm_eff * 4)                   # m / s / lse scratch
    vmem_limit = int(min(max(est + (8 << 20), 32 << 20), 100 << 20))

    last = nvt - 1
    out = pl.pallas_call(
        _generator_kernel,
        out_shape=jax.ShapeDtypeStruct((n_pad, v_pad), out_dtype),
        grid_spec=pltpu.PrefetchScalarGridSpec(
            num_scalar_prefetch=0,
            grid=(n_pad // tm_eff, 2, nvt),    # rows x passes x vocab tiles
            in_specs=[
                # x row tile: resident across the whole two-pass vocab sweep.
                pl.BlockSpec((tm_eff, d_model), lambda i, p, j: (i, 0)),
                # W / bias are only consumed in pass 0; in pass 1 their block
                # index is parked on the last tile -> no re-DMA, weights are
                # streamed from HBM exactly once per row tile.
                pl.BlockSpec((tv_eff, d_model),
                             lambda i, p, j: (j * (1 - p) + last * p, 0)),
                pl.BlockSpec((1, tv_eff),
                             lambda i, p, j: (0, j * (1 - p) + last * p)),
            ],
            # Output parked at (i, 0) during pass 0 (nothing flushed to HBM);
            # walks the vocab tiles in pass 1, each block written exactly once
            # with final data.
            out_specs=pl.BlockSpec((tm_eff, tv_eff),
                                   lambda i, p, j: (i, j * p)),
            scratch_shapes=[
                pltpu.VMEM((tm_eff, 1), jnp.float32),          # running max
                pltpu.VMEM((tm_eff, 1), jnp.float32),          # running sum-exp
                pltpu.VMEM((tm_eff, 1), jnp.float32),          # logsumexp
                pltpu.VMEM((nvt, tm_eff, tv_eff), cache_dtype),  # logits cache
            ],
        ),
        compiler_params=pltpu.CompilerParams(
            dimension_semantics=("parallel", "arbitrary", "arbitrary"),
            vmem_limit_bytes=vmem_limit,
        ),
    )(x2d, w, b2d)

    if n_pad != n or v_pad != vocab:
        out = out[:n, :vocab]
    return out.reshape(batch, seq, vocab)


if __name__ == "__main__":
    # Small shapes consistent with the module.
    batch, seq, d_model, vocab = 2, 8, 32, 128

    key = jax.random.PRNGKey(0)
    kx, kw, kb = jax.random.split(key, 3)

    # Deterministic init (mimics nn.Linear's uniform(-1/sqrt(d), 1/sqrt(d))).
    bound = 1.0 / (d_model ** 0.5)
    weight = jax.random.uniform(kw, (vocab, d_model), jnp.float32, -bound, bound)
    bias = jax.random.uniform(kb, (vocab,), jnp.float32, -bound, bound)
    x = jax.random.normal(kx, (batch, seq, d_model), jnp.float32)

    # Store the weight pre-cast in bf16 once, outside the per-call path, so the
    # wrapper performs no per-call weight cast/pad HBM round trips.
    weight_bf16 = weight.astype(jnp.bfloat16)

    fwd = jax.jit(functools.partial(generator_forward))
    out = jax.block_until_ready(fwd(x, weight_bf16, bias))
    assert out.shape == (batch, seq, vocab)

    # Reference matching the kernel's bf16 matmul precision (f32 epilogue).
    xb = x.astype(jnp.bfloat16).astype(jnp.float32)
    wb = weight_bf16.astype(jnp.float32)
    ref = jax.nn.log_softmax(xb @ wb.T + bias, axis=-1)
    assert jnp.allclose(out.astype(jnp.float32), ref, atol=5e-2, rtol=5e-2)

    print("KERNEL_OK")
</pallas_src>

<mosaic_0001>
module attributes {stable_mosaic.version = 11 : i64} {
  func.func @_generator_kernel(%arg0: i32, %arg1: i32, %arg2: i32, %arg3: memref<16x32xbf16, #tpu.memory_space<vmem>>, %arg4: memref<128x32xbf16, #tpu.memory_space<vmem>>, %arg5: memref<1x128xf32, #tpu.memory_space<vmem>>, %arg6: memref<16x128xbf16, #tpu.memory_space<vmem>>, %arg7: memref<16x1xf32, #tpu.memory_space<vmem>>, %arg8: memref<16x1xf32, #tpu.memory_space<vmem>>, %arg9: memref<16x1xf32, #tpu.memory_space<vmem>>, %arg10: memref<1x16x128xf32, #tpu.memory_space<vmem>>) attributes {dimension_semantics = [#tpu.dimension_semantics<parallel>, #tpu.dimension_semantics<arbitrary>, #tpu.dimension_semantics<arbitrary>], iteration_bounds = array<i64: 1, 2, 1>, scalar_prefetch = 0 : i64, scratch_operands = 4 : i64, tpu.core_type = #tpu.core_type<tc>, window_params = [{transform_indices = @transform_0, window_bounds = array<i64: 16, 32>}, {transform_indices = @transform_1, window_bounds = array<i64: 128, 32>}, {transform_indices = @transform_2, window_bounds = array<i64: 1, 128>}, {transform_indices = @transform_3, window_bounds = array<i64: 16, 128>}]} {
    %c0_i32 = arith.constant 0 : i32
    %0 = arith.cmpi eq, %arg1, %c0_i32 : i32
    %1 = arith.extui %0 : i1 to i32
    %c0_i32_0 = arith.constant 0 : i32
    %2 = arith.cmpi ne, %1, %c0_i32_0 : i32
    scf.if %2 {
      %c0_i32_2 = arith.constant 0 : i32
      %6 = arith.cmpi eq, %arg2, %c0_i32_2 : i32
      %7 = arith.extui %6 : i1 to i32
      %c0_i32_3 = arith.constant 0 : i32
      %8 = arith.cmpi ne, %7, %c0_i32_3 : i32
      scf.if %8 {
        %cst_21 = arith.constant 0xFF800000 : f32
        %35 = vector.broadcast %cst_21 : f32 to vector<16x1xf32>
        %c0_22 = arith.constant 0 : index
        %c0_23 = arith.constant 0 : index
        %36 = vector.load %arg7[%c0_22, %c0_23] : memref<16x1xf32, #tpu.memory_space<vmem>>, vector<16x1xf32>
        tpu.vector_store %arg7[%c0_22, %c0_23], %35 {strides = array<i32>} : memref<16x1xf32, #tpu.memory_space<vmem>>, vector<16x1xf32>,
        %cst_24 = arith.constant 0.000000e+00 : f32
        %37 = vector.broadcast %cst_24 : f32 to vector<16x1xf32>
        %c0_25 = arith.constant 0 : index
        %c0_26 = arith.constant 0 : index
        %38 = vector.load %arg8[%c0_25, %c0_26] : memref<16x1xf32, #tpu.memory_space<vmem>>, vector<16x1xf32>
        tpu.vector_store %arg8[%c0_25, %c0_26], %37 {strides = array<i32>} : memref<16x1xf32, #tpu.memory_space<vmem>>, vector<16x1xf32>,
      } else {
      }
      %c0 = arith.constant 0 : index
      %c0_4 = arith.constant 0 : index
      %9 = vector.load %arg3[%c0, %c0_4] : memref<16x32xbf16, #tpu.memory_space<vmem>>, vector<16x32xbf16>
      %c0_5 = arith.constant 0 : index
      %c0_6 = arith.constant 0 : index
      %10 = vector.load %arg4[%c0_5, %c0_6] : memref<128x32xbf16, #tpu.memory_space<vmem>>, vector<128x32xbf16>
      %cst = arith.constant dense<0.000000e+00> : vector<16x128xf32>
      %11 = tpu.matmul %9, %10, %cst {dimension_numbers = #tpu.dot_dimension_numbers<[1], [1], [0], [0], [0, 0, 1, 0], [], []>} : vector<16x32xbf16>, vector<128x32xbf16>, vector<16x128xf32> -> vector<16x128xf32>
      %c0_7 = arith.constant 0 : index
      %c0_8 = arith.constant 0 : index
      %12 = vector.load %arg5[%c0_7, %c0_8] : memref<1x128xf32, #tpu.memory_space<vmem>>, vector<1x128xf32>
      %13 = vector.broadcast %12 : vector<1x128xf32> to vector<16x128xf32>
      %14 = arith.addf %11, %13 : vector<16x128xf32>
      %15 = arith.index_cast %arg2 : i32 to index
      %c0_9 = arith.constant 0 : index
      %c0_10 = arith.constant 0 : index
      %16 = vector.load %arg10[%15, %c0_9, %c0_10] : memref<1x16x128xf32, #tpu.memory_space<vmem>>, vector<1x16x128xf32>
      %17 = vector.shape_cast %16 : vector<1x16x128xf32> to vector<16x128xf32>
      %18 = vector.shape_cast %14 : vector<16x128xf32> to vector<1x16x128xf32>
      tpu.vector_store %arg10[%15, %c0_9, %c0_10], %18 {strides = array<i32>} : memref<1x16x128xf32, #tpu.memory_space<vmem>>, vector<1x16x128xf32>,
      %c0_11 = arith.constant 0 : index
      %c0_12 = arith.constant 0 : index
      %19 = vector.load %arg7[%c0_11, %c0_12] : memref<16x1xf32, #tpu.memory_space<vmem>>, vector<16x1xf32>
      %cst_13 = arith.constant dense<0xFF800000> : vector<16xf32>
      %20 = vector.multi_reduction <maximumf>, %14, %cst_13 [1] : vector<16x128xf32> to vector<16xf32>
      %21 = vector.shape_cast %20 : vector<16xf32> to vector<16x1xf32>
      %22 = arith.maximumf %19, %21 : vector<16x1xf32>
      %c0_14 = arith.constant 0 : index
      %c0_15 = arith.constant 0 : index
      %23 = vector.load %arg8[%c0_14, %c0_15] : memref<16x1xf32, #tpu.memory_space<vmem>>, vector<16x1xf32>
      %24 = arith.subf %19, %22 : vector<16x1xf32>
      %25 = math.exp %24 : vector<16x1xf32>
      %26 = arith.mulf %23, %25 : vector<16x1xf32>
      %27 = vector.broadcast %22 : vector<16x1xf32> to vector<16x128xf32>
      %28 = arith.subf %14, %27 : vector<16x128xf32>
      %29 = math.exp %28 : vector<16x128xf32>
      %cst_16 = arith.constant dense<0.000000e+00> : vector<16xf32>
      %30 = vector.multi_reduction <add>, %29, %cst_16 [1] : vector<16x128xf32> to vector<16xf32>
      %31 = vector.shape_cast %30 : vector<16xf32> to vector<16x1xf32>
      %32 = arith.addf %26, %31 : vector<16x1xf32>
      %c0_17 = arith.constant 0 : index
      %c0_18 = arith.constant 0 : index
      %33 = vector.load %arg8[%c0_17, %c0_18] : memref<16x1xf32, #tpu.memory_space<vmem>>, vector<16x1xf32>
      tpu.vector_store %arg8[%c0_17, %c0_18], %32 {strides = array<i32>} : memref<16x1xf32, #tpu.memory_space<vmem>>, vector<16x1xf32>,
      %c0_19 = arith.constant 0 : index
      %c0_20 = arith.constant 0 : index
      %34 = vector.load %arg7[%c0_19, %c0_20] : memref<16x1xf32, #tpu.memory_space<vmem>>, vector<16x1xf32>
      tpu.vector_store %arg7[%c0_19, %c0_20], %22 {strides = array<i32>} : memref<16x1xf32, #tpu.memory_space<vmem>>, vector<16x1xf32>,
    } else {
    }
    %c1_i32 = arith.constant 1 : i32
    %3 = arith.cmpi eq, %arg1, %c1_i32 : i32
    %4 = arith.extui %3 : i1 to i32
    %c0_i32_1 = arith.constant 0 : i32
    %5 = arith.cmpi ne, %4, %c0_i32_1 : i32
    scf.if %5 {
      %c0_i32_2 = arith.constant 0 : i32
      %6 = arith.cmpi eq, %arg2, %c0_i32_2 : i32
      %7 = arith.extui %6 : i1 to i32
      %c0_i32_3 = arith.constant 0 : i32
      %8 = arith.cmpi ne, %7, %c0_i32_3 : i32
      scf.if %8 {
        %c0_9 = arith.constant 0 : index
        %c0_10 = arith.constant 0 : index
        %17 = vector.load %arg7[%c0_9, %c0_10] : memref<16x1xf32, #tpu.memory_space<vmem>>, vector<16x1xf32>
        %c0_11 = arith.constant 0 : index
        %c0_12 = arith.constant 0 : index
        %18 = vector.load %arg8[%c0_11, %c0_12] : memref<16x1xf32, #tpu.memory_space<vmem>>, vector<16x1xf32>
        %19 = math.log %18 : vector<16x1xf32>
        %20 = arith.addf %17, %19 : vector<16x1xf32>
        %c0_13 = arith.constant 0 : index
        %c0_14 = arith.constant 0 : index
        %21 = vector.load %arg9[%c0_13, %c0_14] : memref<16x1xf32, #tpu.memory_space<vmem>>, vector<16x1xf32>
        tpu.vector_store %arg9[%c0_13, %c0_14], %20 {strides = array<i32>} : memref<16x1xf32, #tpu.memory_space<vmem>>, vector<16x1xf32>,
      } else {
      }
      %9 = arith.index_cast %arg2 : i32 to index
      %c0 = arith.constant 0 : index
      %c0_4 = arith.constant 0 : index
      %10 = vector.load %arg10[%9, %c0, %c0_4] : memref<1x16x128xf32, #tpu.memory_space<vmem>>, vector<1x16x128xf32>
      %11 = vector.shape_cast %10 : vector<1x16x128xf32> to vector<16x128xf32>
      %c0_5 = arith.constant 0 : index
      %c0_6 = arith.constant 0 : index
      %12 = vector.load %arg9[%c0_5, %c0_6] : memref<16x1xf32, #tpu.memory_space<vmem>>, vector<16x1xf32>
      %13 = vector.broadcast %12 : vector<16x1xf32> to vector<16x128xf32>
      %14 = arith.subf %11, %13 : vector<16x128xf32>
      %15 = arith.truncf %14 : vector<16x128xf32> to vector<16x128xbf16>
      %c0_7 = arith.constant 0 : index
      %c0_8 = arith.constant 0 : index
      %16 = vector.load %arg6[%c0_7, %c0_8] : memref<16x128xbf16, #tpu.memory_space<vmem>>, vector<16x128xbf16>
      tpu.vector_store %arg6[%c0_7, %c0_8], %15 {strides = array<i32>} : memref<16x128xbf16, #tpu.memory_space<vmem>>, vector<16x128xbf16>,
    } else {
    }
    return
  }
  func.func @transform_0(%arg0: i32, %arg1: i32, %arg2: i32) -> (i32, i32) {
    %c0_i32 = arith.constant 0 : i32
    %c0_i32_0 = arith.constant 0 : i32
    return %arg0, %c0_i32 : i32, i32
  }
  func.func @transform_1(%arg0: i32, %arg1: i32, %arg2: i32) -> (i32, i32) {
    %c1_i32 = arith.constant 1 : i32
    %0 = arith.subi %c1_i32, %arg1 : i32
    %1 = arith.muli %arg2, %0 : i32
    %c0_i32 = arith.constant 0 : i32
    %2 = arith.muli %c0_i32, %arg1 : i32
    %3 = arith.addi %1, %2 : i32
    %c0_i32_0 = arith.constant 0 : i32
    %c0_i32_1 = arith.constant 0 : i32
    return %3, %c0_i32_0 : i32, i32
  }
  func.func @transform_2(%arg0: i32, %arg1: i32, %arg2: i32) -> (i32, i32) {
    %c1_i32 = arith.constant 1 : i32
    %0 = arith.subi %c1_i32, %arg1 : i32
    %1 = arith.muli %arg2, %0 : i32
    %c0_i32 = arith.constant 0 : i32
    %2 = arith.muli %c0_i32, %arg1 : i32
    %3 = arith.addi %1, %2 : i32
    %c0_i32_0 = arith.constant 0 : i32
    %c0_i32_1 = arith.constant 0 : i32
    return %c0_i32_0, %3 : i32, i32
  }
  func.func @transform_3(%arg0: i32, %arg1: i32, %arg2: i32) -> (i32, i32) {
    %0 = arith.muli %arg2, %arg1 : i32
    %c0_i32 = arith.constant 0 : i32
    return %arg0, %0 : i32, i32
  }
}

</mosaic_0001>

<bundles_post_ra>
// kernel: generator_forward.1
= control target key start
LH: loop header
LB: loop body
LE: loop exit
PB: predicated region body
PF: predicated region fallthrough
CT: control target
= control target key end

     0   :  { %8 = vsyncpa [#allocation7], 0  ;;  %s949_s0 = inlined_call_operand.vmem [shape: bf16[16,32], index: 0, kind: input, shape index: {}]   ;;  %s950_s1 = inlined_call_operand.vmem [shape: bf16[128,32], index: 1, kind: input, shape index: {}]   ;;  %s951_s2 = inlined_call_operand.vmem [shape: f32[1,128], index: 2, kind: input, shape index: {}]   ;;  %s952_s3 = inlined_call_operand.hbm [shape: bf16[16,128], index: 3, kind: output, shape index: {}]  }
   0x1   :  { %10 = vsyncpa [#allocation7 + $0x1], 0  ;;  %s842_s12 = smov 0   ;;  %s844_s13 = smov 0  }
   0x2   :  { %s846_s14 = smov 0  }
   0x3 LB: > { %s630_s15 = sadd.s32 4294967295, %s812_s14   ;;  %s631_s16 = sadd.s32 4294967294, %s812_s14   ;;  %s812_s14 = sphi %s846_s14, %s16_s14   ;;  %s808_s13 = sphi %s844_s13, %s955_s13   ;;  %s804_s12 = sphi %s842_s12, %s954_s12  }
   0x4   : > { %s31_s17 = sadd.s32 1, %s808_s13  ;;  %p637_p0 = scmp.ge.s32.totalorder %s812_s14, 1 }
   0x5   : > { %p33_p1 = scmp.ge.s32.totalorder %s31_s17, 2  ;;  %p199_p2 = scmp.lt.s32.totalorder %s812_s14, 3 }
   0x7   : > { %s957_s17 = smov (%p33_p1, %s31_s17), 0  ;;  %p200_p3 = pnand %p637_p0, %p199_p2 }
   0x8   : > { %p638_p4 = scmp.ne.s32.totalorder (!%p200_p3), %s804_s12, 0 }
   0x9   : > { %203 = sbr.rel (%p200_p3) target bundleno = 919 (0x397), region = 32 }
  0x10   : > { %264 = sbr.rel (%p638_p4) target bundleno = 731 (0x2db), region = 36  ;;  %v738_v0 = vld [vmem:[%s950_s1] sm:$0xff] (!%p638_p4)   ;;  %v814_v1 = vmov (!%p638_p4), 0.0   ;;  %vm344_vm0 = vcmask (!%p638_p4), 261120   ;;  %v739_v3 = vld [vmem:[%s950_s1 + $0x8] sm:$0xff] (!%p638_p4)   ;;  %vm815_vm1 = vmmov (!%p638_p4), 0  }
  0x11   : > { %673 = vmatprep.subr.bf16.mxu0 (!%p638_p4), %v814_v1  ;;  %v349_v2 = vsel (!%p638_p4), %vm344_vm0, %v738_v0, 0  ;;  %v352_v4 = vsel (!%p638_p4), %vm344_vm0, %v739_v3, 0  ;;  %689 = vmatprep.mubr.msk.bf16.mxu0 (!%p638_p4), %vm815_vm1, %v814_v1  ;;  %v740_v5 = vld [vmem:[%s950_s1 + $0x10] sm:$0xff] (!%p638_p4)   ;;  %v741_v7 = vld [vmem:[%s950_s1 + $0x18] sm:$0xff] (!%p638_p4)   ;;  %v742_v9 = vld [vmem:[%s950_s1 + $0x20] sm:$0xff] (!%p638_p4)   ;;  %vm269_vm2 = vcmask (!%p638_p4), 7168  }
  0x12   : > { %674 = vmatpush3.bf16.xpose.msra.mxu0 (!%p638_p4), %v349_v2  ;;  %v355_v6 = vsel (!%p638_p4), %vm344_vm0, %v740_v5, 0  ;;  %v358_v8 = vsel (!%p638_p4), %vm344_vm0, %v741_v7, 0  ;;  %v361_v10 = vsel (!%p638_p4), %vm344_vm0, %v742_v9, 0  ;;  %v743_v11 = vld [vmem:[%s950_s1 + $0x28] sm:$0xff] (!%p638_p4)   ;;  %v744_v13 = vld [vmem:[%s950_s1 + $0x30] sm:$0xff] (!%p638_p4)   ;;  %v745_v15 = vld [vmem:[%s950_s1 + $0x38] sm:$0xff] (!%p638_p4)  }
  0x13   : > { %675 = vmatprep.subr.bf16.mxu0 (!%p638_p4), %v814_v1  ;;  %v364_v12 = vsel (!%p638_p4), %vm344_vm0, %v743_v11, 0  ;;  %v367_v14 = vsel (!%p638_p4), %vm344_vm0, %v744_v13, 0  ;;  %v370_v16 = vsel (!%p638_p4), %vm344_vm0, %v745_v15, 0  ;;  %v746_v17 = vld [vmem:[%s949_s0] sm:$0xff] (!%p638_p4)   ;;  %v816_v25 = vmov (!%p638_p4), -inf   ;;  %272 = vst.msk [vmem:[#allocation3] sm:$0xff] (!%p638_p4), %vm269_vm2, %v814_v1 }
  0x14   : > { %v639_v18 = vld [vmem:[%s951_s2] ss:$0 sm:$0xff] (!%p638_p4)  ;;  %270 = vst.msk [vmem:[#allocation2] sm:$0xff] (!%p638_p4), %vm269_vm2, %v816_v25  ;;  %271 = vst.msk [vmem:[#allocation2 + $0x8] sm:$0xff] (!%p638_p4), %vm269_vm2, %v816_v25  ;;  %v817_v26 = vmov (!%p638_p4), 0  }
  0x15   : > { %273 = vst.msk [vmem:[#allocation3 + $0x8] sm:$0xff] (!%p638_p4), %vm269_vm2, %v814_v1  ;;  %736 = vset.pattern.permute.xlu1 (!%p638_p4), %v817_v26  ;;  %737 = vset.pattern.permute.xlu0 (!%p638_p4), %v817_v26 }
  0x1a   : > { %676 = vmatpush3.bf16.xpose.msra.mxu0 %v352_v4  ;;  %v425_v46 = vld [vmem:[#allocation3] sm:$0xff] }
  0x1b   : > { %677 = vmatprep.subr.bf16.mxu0 %v814_v1  ;;  %v417_v27 = vld [vmem:[#allocation2] sm:$0xff]  ;;  %v418_v30 = vld [vmem:[#allocation2 + $0x8] sm:$0xff] }
  0x1c   : > { %v426_v50 = vld [vmem:[#allocation3 + $0x8] sm:$0xff] }
  0x22   : > { %678 = vmatpush3.bf16.xpose.msra.mxu0 %v355_v6 }
  0x23   : > { %679 = vmatprep.subr.bf16.mxu0 %v814_v1 }
  0x2a   : > { %680 = vmatpush3.bf16.xpose.msra.mxu0 %v358_v8 }
  0x2b   : > { %681 = vmatprep.subr.bf16.mxu0 %v814_v1 }
  0x32   : > { %682 = vmatpush3.bf16.xpose.msra.mxu0 %v361_v10 }
  0x33   : > { %683 = vmatprep.subr.bf16.mxu0 %v814_v1 }
  0x3a   : > { %684 = vmatpush3.bf16.xpose.msra.mxu0 %v364_v12 }
  0x3b   : > { %685 = vmatprep.subr.bf16.mxu0 %v814_v1 }
  0x42   : > { %686 = vmatpush3.bf16.xpose.msra.mxu0 %v367_v14 }
  0x43   : > { %687 = vmatprep.subr.bf16.mxu0 %v814_v1 }
  0x4a   : > { %688 = vmatpush3.bf16.xpose.msra.mxu0 %v370_v16 }
  0x51   : > { %690 = vmatmul.mubr.msk.bf16.vlgmr.msra.gmra.mrb[0].mxu0 %vm344_vm0, %v746_v17 }
 0x124   : > { %v406_v19 = vpop.f32.mrb[0].mxu0 }
 0x125   : > { %v407_v20 = vadd.f32 %v639_v18, %v406_v19  ;;  %v691_v21 = vpop.f32.mrb[1].mxu0 }
 0x126   : > { %v409_v22 = vpop.f32.mrb[2].mxu0 }
 0x127   : > { %415 = vst [vmem:[#allocation5] sm:$0xff] %v407_v20  ;;  %v410_v23 = vadd.f32 %v639_v18, %v409_v22  ;;  %419 = vmax.xlane.f32.xlu0 %v407_v20  ;;  %v692_v24 = vpop.f32.mrb[3].mxu0 }
 0x129   : > { %416 = vst [vmem:[#allocation5 + $0x8] sm:$0xff] %v410_v23 }
 0x12b   : > { %421 = vmax.xlane.f32.xlu0 %v410_v23 }
 0x1b4   : > { %v420_v28 = vpop.xlane.xlu0 %419 }
 0x1b5   : > { %v423_v29 = vmax.f32 %v417_v27, %v420_v28 }
 0x1b7   : > { %v427_v31 = vsub.f32 %v417_v27, %v423_v29  ;;  %460 = vst.msk [vmem:[#allocation2] sm:$0xff] %vm269_vm2, %v423_v29  ;;  %437 = vperm.xlu1 %736, %v423_v29  }
 0x1b8   : > { %v422_v32 = vpop.xlane.xlu0 %421 }
 0x1b9   : > { %v424_v33 = vmax.f32 %v418_v30, %v422_v32  ;;  %v429_v43 = vmul.f32 1.442695, %v427_v31 }
 0x1bb   : > { %v428_v34 = vsub.f32 %v418_v30, %v424_v33  ;;  %461 = vst.msk [vmem:[#allocation2 + $0x8] sm:$0xff] %vm269_vm2, %v424_v33  ;;  %442 = vperm.xlu1 %736, %v424_v33  }
 0x1bd   : > { %v431_v44 = vmul.f32 1.442695, %v428_v34 }
 0x236   : > { %v438_v35 = vpop.permute.xlu1 %437 }
 0x237   : > { %v445_v36 = vsub.f32 %v407_v20, %v438_v35 }
 0x239   : > { %v447_v37 = vmul.f32 1.442695, %v445_v36 }
 0x23a   : > { %v443_v38 = vpop.permute.xlu1 %442 }
 0x23b   : > { %747 = vpow2.f32 %v447_v37  ;;  %v446_v39 = vsub.f32 %v410_v23, %v443_v38 }
 0x23d   : > { %v449_v40 = vmul.f32 1.442695, %v446_v39 }
 0x23f   : > { %749 = vpow2.f32 %v449_v40 }
 0x240   : > { %751 = vpow2.f32 %v429_v43 }
 0x241   : > { %753 = vpow2.f32 %v431_v44 }
 0x245   : > { %v748_v41 = vpop.eup %747 }
 0x246   : > { %451 = vadd.xlane.f32.xlu0 %v748_v41 }
 0x249   : > { %v750_v42 = vpop.eup %749 }
 0x24a   : > { %453 = vadd.xlane.f32.xlu1 %v750_v42  ;;  %v752_v45 = vpop.eup %751 }
 0x24b   : > { %v433_v47 = vmul.f32 %v752_v45, %v425_v46  ;;  %v754_v48 = vpop.eup %753 }
 0x24c   : > { %v434_v52 = vmul.f32 %v754_v48, %v426_v50 }
 0x2d3   : > { %v452_v49 = vpop.xlane.xlu0 %451 }
 0x2d4   : > { %v455_v51 = vadd.f32 %v452_v49, %v433_v47 }
 0x2d6   : > { %458 = vst.msk [vmem:[#allocation3] sm:$0xff] %vm269_vm2, %v455_v51 }
 0x2d7   : > { %v454_v53 = vpop.xlane.xlu1 %453 }
 0x2d8   : > { %v456_v54 = vadd.f32 %v454_v53, %v434_v52 }
 0x2da   : > { %459 = vst.msk [vmem:[#allocation3 + $0x8] sm:$0xff] %vm269_vm2, %v456_v54 }
 0x2db PF: > { %p650_p5 = scmp.ne.s32.totalorder %s804_s12, 1 }
 0x2dc   : > { %v818_v56 = vmov (!%p650_p5), 0   ;;  %vm480_vm3 = vcmask (!%p650_p5), 7168   ;;  %v485_v5 = vld [vmem:[#allocation5] sm:$0xff] (!%p650_p5)  ;;  %v486_v6 = vld [vmem:[#allocation5 + $0x8] sm:$0xff] (!%p650_p5) }
 0x2dd   : > { %465 = sbr.rel (%p650_p5) target bundleno = 895 (0x37f), region = 44  ;;  %755 = vset.pattern.permute.xlu0 (!%p650_p5), %v818_v56 }
 0x2de   : > { %v472_v55 = vld [vmem:[#allocation3] sm:$0xff] (!%p650_p5) }
 0x2df   : > { %756 = vlog2.f32 (!%p650_p5), %v472_v55  ;;  %v470_v59 = vld [vmem:[#allocation2] sm:$0xff] (!%p650_p5)  ;;  %v471_v62 = vld [vmem:[#allocation2 + $0x8] sm:$0xff] (!%p650_p5) }
 0x2e1   : > { %v473_v57 = vld [vmem:[#allocation3 + $0x8] sm:$0xff] (!%p650_p5) }
 0x2e2   : > { %758 = vlog2.f32 (!%p650_p5), %v473_v57 }
 0x2e9   : > { %v757_v58 = vpop.eup %756 }
 0x2ea   : > { %v475_v61 = vmul.f32 0.6931472, %v757_v58 }
 0x2ec   : > { %v759_v60 = vpop.eup %758  ;;  %v478_v0 = vadd.f32 %v475_v61, %v470_v59 }
 0x2ed   : > { %v477_v63 = vmul.f32 0.6931472, %v759_v60 }
 0x2ee   : > { %481 = vst.msk [vmem:[#allocation4] sm:$0xff] %vm480_vm3, %v478_v0 }
 0x2ef   : > { %v479_v1 = vadd.f32 %v477_v63, %v471_v62 }
 0x2f1   : > { %482 = vst.msk [vmem:[#allocation4 + $0x8] sm:$0xff] %vm480_vm3, %v479_v1 }
 0x2f5   : > { %v487_v2 = vld [vmem:[#allocation4] sm:$0xff] }
 0x2f6   : > { %491 = vperm.xlu0 %755, %v487_v2  }
 0x2f8   : > { %v488_v3 = vld [vmem:[#allocation4 + $0x8] sm:$0xff] }
 0x2fa   : > { %496 = vperm.xlu0 %755, %v488_v3  }
 0x375   : > { %v492_v4 = vpop.permute.xlu0 %491 }
 0x376   : > { %v499_v8 = vsub.f32 %v485_v5, %v492_v4 }
 0x379   : > { %v497_v7 = vpop.permute.xlu0 %496 }
 0x37a   : > { %v500_v9 = vsub.f32 %v486_v6, %v497_v7 }
 0x37c   : > { %v662_v10 = vpack.c.bf16 %v500_v9, %v499_v8 }
 0x37e   : > { %663 = vst [vmem:[#allocation6] sm:$0xff] %v662_v10  }
 0x37f PF: > { %p915_p6 = scmp.eq.s32.totalorder %s630_s15, 1  ;;  %s819_s12 = smov [#allocation6]  }
 0x380   : > { %s527_s18 = sshll.u32 %s819_s12, 4  ;;  %s528_s18 = int_to_ptr.vmem [resolvable:$true] %s527_s18 }
 0x381   : > { %s760_s19 = scalar_lea.vmem %s528_s18, 128  ;;  %s766_s20 = scalar_lea.vmem %s528_s18, 256 }
 0x382   : > { %p761_p7 = scmp.ne.s32.totalorder %s528_s18, %s760_s19  ;;  %p767_p10 = scmp.lt.s32.totalorder %s528_s18, %s528_s18 }
 0x383   : > { %p768_p11 = scmp.lt.s32.totalorder %s766_s20, %s760_s19 }
 0x384   : > { %p762_p8 = pnand %p761_p7, %p915_p6 }
 0x385   : > { %p769_p12 = por %p768_p11, %p767_p10 }
 0x386   : > { %p763_p9 = pneg %p762_p8 }
 0x388   : > { %p770_p13 = pnand %p769_p12, %p763_p9 }
 0x38a   : > { %773 = shalt.err (!%p770_p13)
}
 0x38b   : > { %s774_s22 = scalar_lea.hbm %s952_s3, 128 }
 0x38c   : > { %p775_p0 = scmp.ne.s32.totalorder %s952_s3, %s774_s22  ;;  %p780_p3 = scmp.lt.u32.totalorder %s774_s22, %s952_s3 }
 0x38e   : > { %p776_p1 = pnand %p775_p0, %p915_p6 }
 0x390   : > { %p777_p2 = pneg %p776_p1 }
 0x392   : > { %p782_p4 = pnand %p780_p3, %p777_p2 }
 0x394   : > { %785 = shalt.err (!%p782_p4)
}
 0x395   : > { %s820_s27 = smov 64   ;;  %s821_s28 = smov 4  }
 0x396   : > { %694 = dma.vmem_to_hbm [thread:$0]  (%p915_p6), %s528_s18, 128, %s952_s3, [#allocation7], %s820_s27, %s820_s27, %s821_s28  }
 0x397 PF: > { %p702_p5 = scmp.ge.s32.totalorder %s812_s14, 2  ;;  %p703_p7 = scmp.eq.s32.totalorder %s631_s16, 1 }
 0x399   : > { %p698_p8 = pnand %p703_p7, %p702_p5 }
 0x39b   : > { %799 = dma.done.wait (!%p698_p8), [#allocation7], 128  }
 0x39c   : > { %801 = vsyncadd (!%p698_p8), [#allocation7], 4294967168  ;;  %s16_s14 = sadd.s32 1, %s812_s14   ;;  %s954_s12 = smov %s808_s13 }
 0x39d   : > { %p13_p9 = scmp.ge.s32.totalorder %s16_s14, 4   ;;  %s955_s13 = smov %s957_s17 }
 0x39f   :  { %15 = sbr.rel (!%p13_p9) target bundleno = 3 (0x3), region = 91 }
 0x3a6   :  { %548 = vsyncpa [#allocation7], 1 }
 0x3a7   :  { %550 = vsyncpa [#allocation7 + $0x1], 1 }

</bundles_post_ra>
